<compile_context>
chip_gen: v6e
topology: v6e:2x2x1
jax: 0.10.0
libtpu: 0.0.40
codegen_flags: <defaults>
</compile_context>

<pallas_src>
import jax
import jax.numpy as jnp
from jax.experimental import pallas as pl
from jax.experimental.pallas import tpu as pltpu

_LANES = 128
_MAX_ROWS_PER_STEP = 1024   # 1024 x 128 x 4 B = 512 KiB per input stream per grid step


def _cdiv(a, b):
    return -(-a // b)


def _round_up(a, m):
    return _cdiv(a, m) * m


def _make_kernel(has_input: bool, has_w: bool):
    """Kernel factory specialised on which HBM streams actually exist.

    Ref order: [input rows]?, target rows, [weight rows]?, out, acc scratch.
      data rows : (rows_per_step, 128) f32
      weights   : (rows_per_step, 128) or (rows_per_step, 1) f32 (lane broadcast)
      out       : (1, 8, 128) f32 -- per parallel-slice partial (broadcast scalar)
      acc       : (rows_per_step, 128) f32 VMEM scratch, resident across the
                  reduction axis; reduced to a scalar only on the last step.
    """

    def kernel(*refs):
        idx = 0
        in_ref = None
        w_ref = None
        if has_input:
            in_ref = refs[idx]; idx += 1
        tgt_ref = refs[idx]; idx += 1
        if has_w:
            w_ref = refs[idx]; idx += 1
        out_ref = refs[idx]
        acc_ref = refs[idx + 1]

        j = pl.program_id(1)                      # reduction axis

        @pl.when(j == 0)
        def _init():
            acc_ref[...] = jnp.zeros_like(acc_ref)

        if has_input:
            gap = in_ref[...] - tgt_ref[...]
        else:
            gap = tgt_ref[...]                    # (0 - t)^2 == t^2: zeros stream dropped
        sq = gap * gap                            # real data: |gap|^2 == gap*gap (no abs)
        if has_w:
            sq = w_ref[...] * sq                  # (rows,1) or (rows,128) -> lane broadcast
        acc_ref[...] += sq                        # pure VPU accumulate, no per-step reduce

        @pl.when(j == pl.num_programs(1) - 1)
        def _finalize():                          # one cross-lane/sublane reduce per slice
            out_ref[...] = jnp.broadcast_to(jnp.sum(acc_ref[...]), out_ref.shape)

    return kernel


def _chan0_as_real2d(y, as_complex):
    """Select channel 0; complex values become trailing (re, im) real pairs."""
    y0 = y[:, :, 0]
    if as_complex:
        y0 = y0.astype(jnp.complex64)
        return jnp.stack([jnp.real(y0), jnp.imag(y0)], axis=-1).reshape(y0.shape[0], -1)
    return y0.astype(jnp.float32)


def _to_rows(x2d, n_rows_pad):
    """Flatten (B, n_eff) row-major into a zero-padded (n_rows_pad, 128) slab."""
    flat = x2d.reshape(-1)
    pad = n_rows_pad * _LANES - flat.shape[0]
    if pad:
        flat = jnp.pad(flat, (0, pad))
    return flat.reshape(n_rows_pad, _LANES)


def mse_loss_scat(input_y, target_y, weights_gap=None, weights_l2=None):
    """Pallas implementation of MSELossScat.forward. Returns a scalar loss."""
    B, N, _K = target_y.shape
    has_input = input_y is not None
    is_complex = jnp.iscomplexobj(target_y) or (has_input and jnp.iscomplexobj(input_y))

    tgt2d = _chan0_as_real2d(target_y, is_complex)
    in2d = _chan0_as_real2d(input_y, is_complex) if has_input else None
    n_eff = tgt2d.shape[1]              # N (real) or 2N (complex re/im pairs)
    n_mean = B * N                      # torch .mean() denominator (complex counts once)

    # ---- fold weights_gap (squared) and the mean's 1/(B*N) into one weight ----
    scale = 1.0
    w_arr = None
    w_per_row = False
    if weights_l2 is not None:
        w = jnp.broadcast_to(jnp.asarray(weights_l2, jnp.float32), (B, N))
        if is_complex:
            w = jnp.repeat(w, 2, axis=1)            # same weight for re and im parts
        if weights_gap is not None:
            wg = jnp.asarray(weights_gap, jnp.float32).reshape(B, 1)
            w = w * (wg * wg)
        w_arr = w                                   # (B, n_eff) per-element weights
    elif weights_gap is not None:
        wg2 = (jnp.asarray(weights_gap, jnp.float32).reshape(B) ** 2) / n_mean
        if n_eff % _LANES == 0:
            # each 128-lane row belongs to exactly one batch -> tiny (rows, 1) weight
            w_arr = jnp.repeat(wg2, n_eff // _LANES)
            w_per_row = True
        else:
            w_arr = jnp.broadcast_to(wg2.reshape(B, 1), (B, n_eff))
    else:
        scale = 1.0 / n_mean                        # plain mean: no weight stream at all

    # ---- grid: lane-dense rows, big blocks, 2-way parallel split for v7x ----
    n_elems = B * n_eff
    n_rows = _cdiv(n_elems, _LANES)
    if n_rows <= _MAX_ROWS_PER_STEP:
        n_par, steps = 1, 1                         # small problem: one grid step
    else:
        n_par = 2                                   # v7x: one half per TensorCore
        steps = _cdiv(n_rows, n_par * _MAX_ROWS_PER_STEP)
    rows_per_step = _round_up(_cdiv(n_rows, n_par * steps), 8)
    rows_pad = n_par * steps * rows_per_step

    data_spec = pl.BlockSpec((rows_per_step, _LANES), lambda c, j: (c * steps + j, 0))
    inputs, in_specs = [], []
    if has_input:
        inputs.append(_to_rows(in2d, rows_pad))
        in_specs.append(data_spec)
    inputs.append(_to_rows(tgt2d, rows_pad))
    in_specs.append(data_spec)
    has_w = w_arr is not None
    if has_w:
        if w_per_row:
            pad = rows_pad - w_arr.shape[0]
            w_rows = (jnp.pad(w_arr, (0, pad)) if pad else w_arr).reshape(rows_pad, 1)
            in_specs.append(
                pl.BlockSpec((rows_per_step, 1), lambda c, j: (c * steps + j, 0)))
        else:
            w_rows = _to_rows(w_arr, rows_pad)
            in_specs.append(data_spec)
        inputs.append(w_rows)

    partials = pl.pallas_call(
        _make_kernel(has_input, has_w),
        out_shape=jax.ShapeDtypeStruct((n_par, 8, _LANES), jnp.float32),
        grid_spec=pltpu.PrefetchScalarGridSpec(
            num_scalar_prefetch=0,
            grid=(n_par, steps),
            in_specs=in_specs,
            out_specs=pl.BlockSpec((1, 8, _LANES), lambda c, j: (c, 0, 0)),
            scratch_shapes=[pltpu.VMEM((rows_per_step, _LANES), jnp.float32)],
        ),
        compiler_params=pltpu.CompilerParams(
            dimension_semantics=("parallel", "arbitrary")),
    )(*inputs)

    return jnp.sum(partials[:, 0, 0]) * scale


def _reference(input_y, target_y, weights_gap, weights_l2):
    """Pure-JAX reference mirroring the PyTorch forward."""
    if input_y is None:
        gap = jnp.zeros_like(target_y) - target_y
    else:
        gap = input_y - target_y
    gap = gap[:, :, 0]
    if weights_gap is not None:
        gap = jnp.asarray(weights_gap)[:, None] * gap
    sq = jnp.abs(gap) ** 2
    if weights_l2 is None:
        return jnp.mean(sq)
    return jnp.sum(jnp.asarray(weights_l2) * sq)


if __name__ == "__main__":
    key = jax.random.PRNGKey(0)
    ks = jax.random.split(key, 16)

    B, N, K = 4, 256, 3   # batch, num scattering coefficients, channel dim
    input_y = jax.random.normal(ks[0], (B, N, K), jnp.float32)
    target_y = jax.random.normal(ks[1], (B, N, K), jnp.float32)
    weights_gap = jax.random.uniform(ks[2], (B,), jnp.float32) + 0.5
    weights_l2 = jax.random.uniform(ks[3], (B, N), jnp.float32)

    # non-multiple-of-128 N (tail-padding path)
    in_odd = jax.random.normal(ks[4], (2, 200, K), jnp.float32)
    tg_odd = jax.random.normal(ks[5], (2, 200, K), jnp.float32)

    # complex scattering coefficients (|gap|^2 = re^2 + im^2 path)
    cin = (jax.random.normal(ks[6], (2, 128, 2), jnp.float32)
           + 1j * jax.random.normal(ks[7], (2, 128, 2), jnp.float32))
    ctg = (jax.random.normal(ks[8], (2, 128, 2), jnp.float32)
           + 1j * jax.random.normal(ks[9], (2, 128, 2), jnp.float32))
    cwl2 = jax.random.uniform(ks[10], (2, 128), jnp.float32)
    cwg = jax.random.uniform(ks[11], (2,), jnp.float32) + 0.5

    # larger case: exercises multi-step reduction + 2-way parallel grid (n_rows > 1024)
    big_in = jax.random.normal(ks[12], (2, 163840, 1), jnp.float32)
    big_tg = jax.random.normal(ks[13], (2, 163840, 1), jnp.float32)
    big_wg = jax.random.uniform(ks[14], (2,), jnp.float32) + 0.5
    big_wl = jax.random.uniform(ks[15], (2, 163840), jnp.float32)

    cases = [
        ("mean",          input_y, target_y, None,        None,       1e-5, 1e-6),
        ("weighted",      input_y, target_y, weights_gap, weights_l2, 1e-5, 1e-6),
        ("input_none",    None,    target_y, None,        None,       1e-5, 1e-6),
        ("gap_only",      input_y, target_y, weights_gap, None,       1e-5, 1e-6),
        ("odd_n",         in_odd,  tg_odd,   None,        None,       1e-5, 1e-6),
        ("complex_w",     cin,     ctg,      cwg,         cwl2,       1e-5, 1e-6),
        ("big_multistep", big_in,  big_tg,   big_wg,      big_wl,     1e-4, 1e-5),
    ]

    for name, iy, ty, wg, wl in [(c[0], c[1], c[2], c[3], c[4]) for c in cases]:
        pass  # keep flake-style linters quiet about unused tuple unpack pattern

    for name, iy, ty, wg, wl, rtol, atol in cases:
        got = mse_loss_scat(iy, ty, wg, wl)
        jax.block_until_ready(got)
        ref = _reference(iy, ty, wg, wl)
        if not jnp.allclose(got, ref, rtol=rtol, atol=atol):
            raise AssertionError(f"{name}: kernel={got} ref={ref}")

    print("KERNEL_OK")
</pallas_src>

<mosaic_0001>
module attributes {stable_mosaic.version = 11 : i64} {
  func.func @kernel(%arg0: i32, %arg1: i32, %arg2: memref<8x128xf32, #tpu.memory_space<vmem>>, %arg3: memref<8x128xf32, #tpu.memory_space<vmem>>, %arg4: memref<1x8x128xf32, #tpu.memory_space<vmem>>, %arg5: memref<8x128xf32, #tpu.memory_space<vmem>>) attributes {dimension_semantics = [#tpu.dimension_semantics<parallel>, #tpu.dimension_semantics<arbitrary>], iteration_bounds = array<i64: 1, 1>, scalar_prefetch = 0 : i64, scratch_operands = 1 : i64, tpu.core_type = #tpu.core_type<tc>, window_params = [{transform_indices = @transform_0, window_bounds = array<i64: 8, 128>}, {transform_indices = @transform_1, window_bounds = array<i64: 8, 128>}, {transform_indices = @transform_2, window_bounds = array<i64: 1, 8, 128>}]} {
    %c0_i32 = arith.constant 0 : i32
    %0 = arith.cmpi eq, %arg1, %c0_i32 : i32
    %1 = arith.extui %0 : i1 to i32
    %c0_i32_0 = arith.constant 0 : i32
    %2 = arith.cmpi ne, %1, %c0_i32_0 : i32
    scf.if %2 {
      %cst = arith.constant 0.000000e+00 : f32
      %13 = vector.broadcast %cst : f32 to vector<8x128xf32>
      %c0_10 = arith.constant 0 : index
      %c0_11 = arith.constant 0 : index
      %14 = vector.load %arg5[%c0_10, %c0_11] : memref<8x128xf32, #tpu.memory_space<vmem>>, vector<8x128xf32>
      tpu.vector_store %arg5[%c0_10, %c0_11], %13 {strides = array<i32>} : memref<8x128xf32, #tpu.memory_space<vmem>>, vector<8x128xf32>,
    } else {
    }
    %c0 = arith.constant 0 : index
    %c0_1 = arith.constant 0 : index
    %3 = vector.load %arg2[%c0, %c0_1] : memref<8x128xf32, #tpu.memory_space<vmem>>, vector<8x128xf32>
    %c0_2 = arith.constant 0 : index
    %c0_3 = arith.constant 0 : index
    %4 = vector.load %arg3[%c0_2, %c0_3] : memref<8x128xf32, #tpu.memory_space<vmem>>, vector<8x128xf32>
    %5 = arith.subf %3, %4 : vector<8x128xf32>
    %6 = arith.mulf %5, %5 : vector<8x128xf32>
    %c0_4 = arith.constant 0 : index
    %c0_5 = arith.constant 0 : index
    %7 = vector.load %arg5[%c0_4, %c0_5] : memref<8x128xf32, #tpu.memory_space<vmem>>, vector<8x128xf32>
    %8 = arith.addf %7, %6 : vector<8x128xf32>
    %c0_6 = arith.constant 0 : index
    %c0_7 = arith.constant 0 : index
    %9 = vector.load %arg5[%c0_6, %c0_7] : memref<8x128xf32, #tpu.memory_space<vmem>>, vector<8x128xf32>
    tpu.vector_store %arg5[%c0_6, %c0_7], %8 {strides = array<i32>} : memref<8x128xf32, #tpu.memory_space<vmem>>, vector<8x128xf32>,
    %c0_i32_8 = arith.constant 0 : i32
    %10 = arith.cmpi eq, %arg1, %c0_i32_8 : i32
    %11 = arith.extui %10 : i1 to i32
    %c0_i32_9 = arith.constant 0 : i32
    %12 = arith.cmpi ne, %11, %c0_i32_9 : i32
    scf.if %12 {
      %c0_10 = arith.constant 0 : index
      %c0_11 = arith.constant 0 : index
      %13 = vector.load %arg5[%c0_10, %c0_11] : memref<8x128xf32, #tpu.memory_space<vmem>>, vector<8x128xf32>
      %14 = vector.shape_cast %13 : vector<8x128xf32> to vector<1x8x128xf32>
      %cst = arith.constant dense<0.000000e+00> : vector<1xf32>
      %15 = vector.multi_reduction <add>, %14, %cst [1, 2] : vector<1x8x128xf32> to vector<1xf32>
      %16 = vector.shape_cast %15 : vector<1xf32> to vector<1x1x1xf32>
      %17 = vector.extract %16[0, 0, 0] : f32 from vector<1x1x1xf32>
      %18 = vector.broadcast %17 : f32 to vector<1x8x128xf32>
      %c0_12 = arith.constant 0 : index
      %c0_13 = arith.constant 0 : index
      %c0_14 = arith.constant 0 : index
      %19 = vector.load %arg4[%c0_12, %c0_13, %c0_14] : memref<1x8x128xf32, #tpu.memory_space<vmem>>, vector<1x8x128xf32>
      tpu.vector_store %arg4[%c0_12, %c0_13, %c0_14], %18 {strides = array<i32>} : memref<1x8x128xf32, #tpu.memory_space<vmem>>, vector<1x8x128xf32>,
    } else {
    }
    return
  }
  func.func @transform_0(%arg0: i32, %arg1: i32) -> (i32, i32) {
    %c1_i32 = arith.constant 1 : i32
    %0 = arith.muli %arg0, %c1_i32 : i32
    %1 = arith.addi %0, %arg1 : i32
    %c0_i32 = arith.constant 0 : i32
    %c0_i32_0 = arith.constant 0 : i32
    return %1, %c0_i32 : i32, i32
  }
  func.func @transform_1(%arg0: i32, %arg1: i32) -> (i32, i32) {
    %c1_i32 = arith.constant 1 : i32
    %0 = arith.muli %arg0, %c1_i32 : i32
    %1 = arith.addi %0, %arg1 : i32
    %c0_i32 = arith.constant 0 : i32
    %c0_i32_0 = arith.constant 0 : i32
    return %1, %c0_i32 : i32, i32
  }
  func.func @transform_2(%arg0: i32, %arg1: i32) -> (i32, i32, i32) {
    %c0_i32 = arith.constant 0 : i32
    %c0_i32_0 = arith.constant 0 : i32
    %c0_i32_1 = arith.constant 0 : i32
    return %arg0, %c0_i32, %c0_i32_0 : i32, i32, i32
  }
}

</mosaic_0001>

<bundles_post_ra>
// kernel: tpu_custom_call.1
= control target key start
LH: loop header
LB: loop body
LE: loop exit
PB: predicated region body
PF: predicated region fallthrough
CT: control target
= control target key end

     0   :  { %7 = vsyncpa [#allocation4], 0  ;;  %s185_s0 = inlined_call_operand.hbm [shape: f32[8,128], index: 0, kind: input, shape index: {}]   ;;  %s186_s1 = inlined_call_operand.hbm [shape: f32[8,128], index: 1, kind: input, shape index: {}]   ;;  %s187_s2 = inlined_call_operand.hbm [shape: f32[1,8,128], index: 2, kind: output, shape index: {}]  }
   0x1   :  { %8 = vsyncpa [#allocation7], 0 }
   0x2   :  { %9 = vsyncpa [#allocation5], 0  ;;  %s158_s9 = smov [#allocation3]   ;;  %s159_s11 = smov [#allocation6]  }
   0x3   :  { %s19_s10 = sshll.u32 %s158_s9, 4  ;;  %s32_s12 = sshll.u32 %s159_s11, 4  ;;  %s20_s10 = int_to_ptr.vmem [resolvable:$true] %s19_s10  ;;  %s33_s12 = int_to_ptr.vmem [resolvable:$true] %s32_s12 }
   0x4   :  { %s100_s13 = scalar_lea.vmem %s20_s10, 128  ;;  %p105_p1 = scmp.lt.s32.totalorder %s20_s10, %s20_s10 }
   0x5   :  { %p101_p0 = scmp.ne.s32.totalorder %s20_s10, %s100_s13  ;;  %p106_p2 = scmp.lt.s32.totalorder %s100_s13, %s100_s13 }
   0x7   :  { %p107_p3 = por %p106_p2, %p105_p1 }
   0x9   :  { %p108_p4 = pnand %p107_p3, %p101_p0 }
   0xb   :  { %111 = shalt.err (!%p108_p4)
}
   0xc   :  { %22 = dma.hbm_to_vmem [thread:$0]  %s185_s0, 128, %s20_s10, [#allocation4]  }
   0xd   :  { %s120_s16 = scalar_lea.vmem %s33_s12, 128  ;;  %p125_p6 = scmp.lt.s32.totalorder %s33_s12, %s33_s12 }
   0xe   :  { %p121_p5 = scmp.ne.s32.totalorder %s33_s12, %s120_s16  ;;  %p126_p7 = scmp.lt.s32.totalorder %s120_s16, %s120_s16 }
  0x10   :  { %p127_p8 = por %p126_p7, %p125_p6 }
  0x12   :  { %p128_p9 = pnand %p127_p8, %p121_p5 }
  0x14   :  { %131 = shalt.err (!%p128_p9)
}
  0x15   :  { %35 = dma.hbm_to_vmem [thread:$0]  %s186_s1, 128, %s33_s12, [#allocation7]  }
  0x16   :  { %152 = dma.done.wait [#allocation4], 128  }
  0x17   :  { %153 = vsyncadd [#allocation4], 4294967168 }
  0x18   :  { %154 = dma.done.wait [#allocation7], 128  }
  0x19   :  { %155 = vsyncadd [#allocation7], 4294967168  ;;  %v49_v0 = vld [vmem:[#allocation3] sm:$0xff]  ;;  %v50_v1 = vld [vmem:[#allocation6] sm:$0xff]  ;;  %s160_s0 = smov [#allocation8]  }
  0x1a   :  { %v51_v2 = vsub.f32 %v49_v0, %v50_v1  ;;  %s77_s19 = sshll.u32 %s160_s0, 4  ;;  %s78_s19 = int_to_ptr.vmem [resolvable:$true] %s77_s19 }
  0x1b   :  { %s132_s20 = scalar_lea.vmem %s78_s19, 128  ;;  %p137_p11 = scmp.lt.s32.totalorder %s78_s19, %s78_s19 }
  0x1c   :  { %v52_v3 = vmul.f32 %v51_v2, %v51_v2  ;;  %p133_p10 = scmp.ne.s32.totalorder %s78_s19, %s132_s20  ;;  %p138_p12 = scmp.lt.s32.totalorder %s132_s20, %s132_s20 }
  0x1e   :  { %60 = vadd.xlane.f32.xlu0 %v52_v3  ;;  %p139_p13 = por %p138_p12, %p137_p11 }
  0x20   :  { %p140_p0 = pnand %p139_p13, %p133_p10 }
  0xa7   :  { %v61_v4 = vpop.xlane.xlu0 %60 }
  0xa8   :  { %v62_v5 = vrot.slane %v61_v4, 4 }
  0xaa   :  { %v63_v6 = vadd.f32 %v62_v5, %v61_v4 }
  0xac   :  { %v64_v7 = vrot.slane %v63_v6, 2 }
  0xae   :  { %v65_v8 = vadd.f32 %v64_v7, %v63_v6 }
  0xb0   :  { %v66_v9 = vrot.slane %v65_v8, 1 }
  0xb2   :  { %v67_v10 = vadd.f32 %v66_v9, %v65_v8 }
  0xb4   :  { %87 = vpush %v67_v10 }
  0xe5   :  { %s88_s1 = spop %87 }
  0xe6   :  { %v69_v11 = vstv %s88_s1 }
  0xe7   :  { %70 = vst [vmem:[#allocation8] sm:$0xff] %v69_v11 }
  0xe8   :  { %143 = shalt.err (!%p140_p0)
}
  0xe9   :  { %80 = dma.vmem_to_hbm [thread:$0]  %s78_s19, 128, %s187_s2, [#allocation5]  }
  0xea   :  { %156 = dma.done.wait [#allocation5], 128  }
  0xeb   :  { %157 = vsyncadd [#allocation5], 4294967168 }
  0xec   :  { %84 = vsyncpa [#allocation4], 1 }
  0xed   :  { %85 = vsyncpa [#allocation7], 1 }
  0xee   :  { %86 = vsyncpa [#allocation5], 1 }

</bundles_post_ra>
